<compile_context>
chip_gen: v5e
topology: v5e:2x2
jax: 0.10.0
libtpu: 0.0.40
codegen_flags: <defaults>
</compile_context>

<pallas_src>
import math
import jax
import jax.numpy as jnp
from jax.experimental import pallas as pl
from jax.experimental.pallas import tpu as pltpu


def _embed_kernel(x_ref, wlin_ref, wpw_ref, b_ref, o_ref):
    # Load row tile; square in f32 (VPU-native on all chips, incl. v5e which
    # has no bf16 VALU), then cast the matmul operands to the weight dtype
    # (bf16 on v6e/v7x) so the MXU runs at its fast-operand rate.
    x = x_ref[...].astype(jnp.float32)
    xsq = x * x

    wlin = wlin_ref[...]
    wpw = wpw_ref[...]
    cd = wlin.dtype

    acc = jnp.dot(x.astype(cd), wlin, preferred_element_type=jnp.float32)
    acc = acc + jnp.dot(xsq.astype(cd), wpw, preferred_element_type=jnp.float32)
    acc = acc + b_ref[...]          # single folded bias (f32)
    o_ref[...] = acc.astype(o_ref.dtype)


def _round_up(v, m):
    return ((v + m - 1) // m) * m


def power_system_embedding(x, params, *, tm=256, compute_dtype=jnp.float32):
    """x: [..., D_in] float32. params: dict of weights (see init_params)."""
    orig_shape = x.shape
    d_in = orig_shape[-1]
    x2d = x.reshape(-1, d_in)
    n = x2d.shape[0]
    d_out = params["w1"].shape[0]

    # ---- host-side algebraic fold of the combine layer ----
    w3a = params["w3"][:, :d_out]                 # acts on linear branch
    w3b = params["w3"][:, d_out:]                 # acts on power branch
    wlin = params["w1"].T @ w3a.T                 # [D_in, D_out]
    wpw = params["w2"].T @ w3b.T                  # [D_in, D_out]
    bfold = params["b1"] @ w3a.T + params["b2"] @ w3b.T + params["b3"]  # [D_out]

    # ---- pad to lane/MXU-friendly shapes (multiples of 128 / tile rows) ----
    d_in_p = _round_up(d_in, 128)
    d_out_p = _round_up(d_out, 128)
    tm = max(8, min(tm, _round_up(n, 8)))         # don't over-pad tiny batches
    n_p = _round_up(n, tm)

    xp = jnp.zeros((n_p, d_in_p), x2d.dtype).at[:n, :d_in].set(x2d)
    wlin_p = (jnp.zeros((d_in_p, d_out_p), jnp.float32)
              .at[:d_in, :d_out].set(wlin).astype(compute_dtype))
    wpw_p = (jnp.zeros((d_in_p, d_out_p), jnp.float32)
             .at[:d_in, :d_out].set(wpw).astype(compute_dtype))
    b_p = jnp.zeros((1, d_out_p), jnp.float32).at[0, :d_out].set(bfold)

    grid = (n_p // tm,)
    const = lambda i: (0, 0)      # weights / bias: same full block every step

    out_p = pl.pallas_call(
        _embed_kernel,
        out_shape=jax.ShapeDtypeStruct((n_p, d_out_p), x2d.dtype),
        grid_spec=pltpu.PrefetchScalarGridSpec(
            num_scalar_prefetch=0,
            grid=grid,
            in_specs=[
                pl.BlockSpec((tm, d_in_p), lambda i: (i, 0)),   # x row tile
                pl.BlockSpec((d_in_p, d_out_p), const),         # folded Wlin
                pl.BlockSpec((d_in_p, d_out_p), const),         # folded Wpw
                pl.BlockSpec((1, d_out_p), const),              # folded bias
            ],
            out_specs=pl.BlockSpec((tm, d_out_p), lambda i: (i, 0)),
        ),
        compiler_params=pltpu.CompilerParams(
            dimension_semantics=("parallel",)),
    )(xp, wlin_p, wpw_p, b_p)

    out = out_p[:n, :d_out]
    return out.reshape(*orig_shape[:-1], d_out)


def _xavier_normal(key, shape, gain=0.5):
    # nn.init.xavier_normal_ on a Linear weight [out, in]:
    # std = gain * sqrt(2 / (fan_in + fan_out))
    fan_out, fan_in = shape
    std = gain * math.sqrt(2.0 / (fan_in + fan_out))
    return std * jax.random.normal(key, shape, dtype=jnp.float32)


def init_params(key, input_dim, output_dim):
    k1, k2, k3 = jax.random.split(key, 3)
    return {
        "w1": _xavier_normal(k1, (output_dim, input_dim)),       # self.linear
        "b1": jnp.zeros((output_dim,), jnp.float32),
        "w2": _xavier_normal(k2, (output_dim, input_dim)),       # self.power_transform
        "b2": jnp.zeros((output_dim,), jnp.float32),
        "w3": _xavier_normal(k3, (output_dim, 2 * output_dim)),  # self.combine
        "b3": jnp.zeros((output_dim,), jnp.float32),
    }


def reference_forward(x, p):
    lin = x @ p["w1"].T + p["b1"]
    pw = (x ** 2) @ p["w2"].T + p["b2"]
    combined = jnp.concatenate([lin, pw], axis=-1)
    return combined @ p["w3"].T + p["b3"]


if __name__ == "__main__":
    key = jax.random.PRNGKey(0)
    kx, kp = jax.random.split(key)

    N, D_IN, D_OUT = 512, 16, 32
    x = jax.random.normal(kx, (N, D_IN), dtype=jnp.float32)
    params = init_params(kp, D_IN, D_OUT)

    ref = reference_forward(x, params)

    # f32 path (tight check against the PyTorch-equivalent reference)
    out = jax.block_until_ready(power_system_embedding(x, params, tm=256))
    assert out.shape == (N, D_OUT)
    assert jnp.allclose(out, ref, atol=1e-4, rtol=1e-4), "f32 mismatch vs reference"

    # bf16-operand path (v6e/v7x fast MXU mode); accumulation stays f32
    out_bf16 = jax.block_until_ready(
        power_system_embedding(x, params, tm=256, compute_dtype=jnp.bfloat16))
    assert out_bf16.shape == (N, D_OUT)
    assert jnp.allclose(out_bf16, ref, atol=5e-2, rtol=5e-2), "bf16 mismatch vs reference"

    print("KERNEL_OK")
</pallas_src>

<mosaic_0001>
module attributes {stable_mosaic.version = 11 : i64} {
  func.func @_embed_kernel(%arg0: i32, %arg1: memref<256x128xf32, #tpu.memory_space<vmem>>, %arg2: memref<128x128xf32, #tpu.memory_space<vmem>>, %arg3: memref<128x128xf32, #tpu.memory_space<vmem>>, %arg4: memref<1x128xf32, #tpu.memory_space<vmem>>, %arg5: memref<256x128xf32, #tpu.memory_space<vmem>>) attributes {dimension_semantics = [#tpu.dimension_semantics<parallel>], iteration_bounds = array<i64: 2>, scalar_prefetch = 0 : i64, scratch_operands = 0 : i64, tpu.core_type = #tpu.core_type<tc>, window_params = [{transform_indices = @transform_0, window_bounds = array<i64: 256, 128>}, {pipeline_mode = #tpu.pipeline_mode<synchronous>, transform_indices = @transform_1, window_bounds = array<i64: 128, 128>}, {pipeline_mode = #tpu.pipeline_mode<synchronous>, transform_indices = @transform_2, window_bounds = array<i64: 128, 128>}, {pipeline_mode = #tpu.pipeline_mode<synchronous>, transform_indices = @transform_3, window_bounds = array<i64: 1, 128>}, {transform_indices = @transform_4, window_bounds = array<i64: 256, 128>}]} {
    %c0 = arith.constant 0 : index
    %c0_0 = arith.constant 0 : index
    %0 = vector.load %arg1[%c0, %c0_0] : memref<256x128xf32, #tpu.memory_space<vmem>>, vector<256x128xf32>
    %1 = arith.mulf %0, %0 : vector<256x128xf32>
    %c0_1 = arith.constant 0 : index
    %c0_2 = arith.constant 0 : index
    %2 = vector.load %arg2[%c0_1, %c0_2] : memref<128x128xf32, #tpu.memory_space<vmem>>, vector<128x128xf32>
    %c0_3 = arith.constant 0 : index
    %c0_4 = arith.constant 0 : index
    %3 = vector.load %arg3[%c0_3, %c0_4] : memref<128x128xf32, #tpu.memory_space<vmem>>, vector<128x128xf32>
    %cst = arith.constant dense<0.000000e+00> : vector<256x128xf32>
    %4 = tpu.matmul %0, %2, %cst {dimension_numbers = #tpu.dot_dimension_numbers<[1], [0], [0], [1], [0, 0, 1, 1], [], []>} : vector<256x128xf32>, vector<128x128xf32>, vector<256x128xf32> -> vector<256x128xf32>
    %cst_5 = arith.constant dense<0.000000e+00> : vector<256x128xf32>
    %5 = tpu.matmul %1, %3, %cst_5 {dimension_numbers = #tpu.dot_dimension_numbers<[1], [0], [0], [1], [0, 0, 1, 1], [], []>} : vector<256x128xf32>, vector<128x128xf32>, vector<256x128xf32> -> vector<256x128xf32>
    %6 = arith.addf %4, %5 : vector<256x128xf32>
    %c0_6 = arith.constant 0 : index
    %c0_7 = arith.constant 0 : index
    %7 = vector.load %arg4[%c0_6, %c0_7] : memref<1x128xf32, #tpu.memory_space<vmem>>, vector<1x128xf32>
    %8 = vector.broadcast %7 : vector<1x128xf32> to vector<256x128xf32>
    %9 = arith.addf %6, %8 : vector<256x128xf32>
    %c0_8 = arith.constant 0 : index
    %c0_9 = arith.constant 0 : index
    %10 = vector.load %arg5[%c0_8, %c0_9] : memref<256x128xf32, #tpu.memory_space<vmem>>, vector<256x128xf32>
    tpu.vector_store %arg5[%c0_8, %c0_9], %9 {strides = array<i32>} : memref<256x128xf32, #tpu.memory_space<vmem>>, vector<256x128xf32>,
    return
  }
  func.func @transform_0(%arg0: i32) -> (i32, i32) {
    %c0_i32 = arith.constant 0 : i32
    %c0_i32_0 = arith.constant 0 : i32
    return %arg0, %c0_i32 : i32, i32
  }
  func.func @transform_1(%arg0: i32) -> (i32, i32) {
    %c0_i32 = arith.constant 0 : i32
    %c0_i32_0 = arith.constant 0 : i32
    %c0_i32_1 = arith.constant 0 : i32
    return %c0_i32, %c0_i32_0 : i32, i32
  }
  func.func @transform_2(%arg0: i32) -> (i32, i32) {
    %c0_i32 = arith.constant 0 : i32
    %c0_i32_0 = arith.constant 0 : i32
    %c0_i32_1 = arith.constant 0 : i32
    return %c0_i32, %c0_i32_0 : i32, i32
  }
  func.func @transform_3(%arg0: i32) -> (i32, i32) {
    %c0_i32 = arith.constant 0 : i32
    %c0_i32_0 = arith.constant 0 : i32
    %c0_i32_1 = arith.constant 0 : i32
    return %c0_i32, %c0_i32_0 : i32, i32
  }
  func.func @transform_4(%arg0: i32) -> (i32, i32) {
    %c0_i32 = arith.constant 0 : i32
    %c0_i32_0 = arith.constant 0 : i32
    return %arg0, %c0_i32 : i32, i32
  }
}

</mosaic_0001>

<bundles_post_ra>
// kernel: tpu_custom_call.1
= control target key start
LH: loop header
LB: loop body
LE: loop exit
PB: predicated region body
PF: predicated region fallthrough
CT: control target
= control target key end

     0   :  { %9 = vsyncpa [#allocation3], 0  ;;  %s1328_s0 = inlined_call_operand.hbm [shape: f32[512,128], index: 0, kind: input, shape index: {}]   ;;  %s1329_s1 = inlined_call_operand.hbm [shape: f32[128,128], index: 1, kind: input, shape index: {}]   ;;  %s1330_s2 = inlined_call_operand.hbm [shape: f32[128,128], index: 2, kind: input, shape index: {}]   ;;  %s1331_s3 = inlined_call_operand.vmem [shape: f32[1,128], index: 3, kind: input, shape index: {}]   ;;  %s1332_s4 = inlined_call_operand.hbm [shape: f32[512,128], index: 4, kind: output, shape index: {}]  }
   0x1   :  { %11 = vsyncpa [#allocation3 + $0x1], 0 }
   0x2   :  { %12 = vsyncpa [#allocation6], 0 }
   0x3   :  { %13 = vsyncpa [#allocation4], 0 }
   0x4   :  { %15 = vsyncpa [#allocation4 + $0x1], 0  ;;  %s1068_s15 = smov 0   ;;  %s1070_s16 = smov 0  }
   0x5   :  { %s1072_s17 = smov 0   ;;  %s1074_s18 = smov 0  }
   0x6 LB: > { %s1089_s19 = sadd.s32 4294967295, %s1035_s18   ;;  %s751_s20 = sadd.s32 4294967294, %s1035_s18   ;;  %s1035_s18 = sphi %s1074_s18, %s1342_s18   ;;  %s1031_s17 = sphi %s1072_s17, %s1341_s17   ;;  %s1027_s16 = sphi %s1070_s16, %s1340_s16   ;;  %s1023_s15 = sphi %s1068_s15, %s1339_s15  }
   0x7   : > { %p41_p0 = scmp.ne.s32.totalorder %s1027_s16, %s1023_s15  ;;  %p42_p1 = scmp.eq.s32.totalorder %s1089_s19, 0 }
   0x8   : > { %p128_p2 = scmp.eq.s32.totalorder %s1089_s19, 1  ;;  %p134_p3 = scmp.eq.s32.totalorder %s751_s20, 1 }
   0x9   : > { %p1098_p4 = por %p42_p1, %p41_p0  ;;  %p752_p5 = scmp.ge.s32.totalorder %s1035_s18, 1 }
   0xa   : > { %p1103_p6 = por %p134_p3, %p41_p0  ;;  %p141_p7 = scmp.lt.s32.totalorder %s1035_s18, 3 }
   0xb   : > { %s152_s25 = sshll.u32 %s1329_s1, 4  ;;  %s1037_s27 = smov [#allocation5]   ;;  %s153_s25 = int_to_ptr.hbm [resolvable:$true] %s152_s25 }
   0xc   : > { %p1111_p8 = pnand %p752_p5, %p141_p7  ;;  %s154_s28 = sshll.u32 %s1037_s27, 4  ;;  %s155_s28 = int_to_ptr.vmem [resolvable:$true] %s154_s28 }
   0xd   : > { %s166_s5 = sshll.u32 %s1330_s2, 4  ;;  %s1038_s6 = smov 128   ;;  %s167_s5 = int_to_ptr.hbm [resolvable:$true] %s166_s5 }
   0xe   : > { %p815_p9 = pneg %p1111_p8  ;;  %s1039_s7 = smov 8  }
   0xf   : > { %s1040_s8 = smov [#allocation7]   ;;  %s1130_s10 = sadd.s32 1, %s1035_s18  }
  0x10   : > { %p816_p10 = pnand %p815_p9, %p42_p1  ;;  %s168_s9 = sshll.u32 %s1040_s8, 4  ;;  %s169_s9 = int_to_ptr.vmem [resolvable:$true] %s168_s9 }
  0x11   : > { %s28_s11 = sadd.s32 1, %s1031_s17  ;;  %s25_s12 = ssub.s32 %s1035_s18, %s1130_s10 }
  0x12   : > { %818 = dma.hbm_to_vmem [thread:$0]  (!%p816_p10), %s153_s25, 2048, %s155_s28, [#allocation6], %s1038_s6, %s1038_s6, %s1039_s7  }
  0x13   : > { %821 = dma.hbm_to_vmem [thread:$0]  (!%p816_p10), %s167_s5, 2048, %s169_s9, [#allocation6], %s1038_s6, %s1038_s6, %s1039_s7  }
  0x14   : > { %p35_p12 = scmp.ne.s32.totalorder %s1031_s17, %s1027_s16  ;;  %p26_p13 = scmp.eq.s32.totalorder %s25_s12, 0 }
  0x15   : > { %p36_p0 = scmp.eq.s32.totalorder %s1035_s18, 0  ;;  %p832_p5 = scmp.lt.s32.totalorder %s1035_s18, 2 }
  0x16   : > { %p1140_p3 = por %p128_p2, %p35_p12  ;;  %s185_s20 = sand.u32 1, %s1031_s17  }
  0x17   : > { %s1146_s14 = scalar_select %p26_p13, %s1031_s17, %s28_s11  }
  0x18   : > { %p37_p7 = por %p36_p0, %p35_p12  ;;  %s756_s23 = sshll.u32 %s185_s20, 8 }
  0x19   : > { %s769_s24 = sshll.u32 %s1035_s18, 8  ;;  %s189_s29 = scalar_lea.vmem [#allocation2], %s756_s23 }
  0x1a   : > { %s194_s28 = scalar_lea.hbm %s1328_s0, %s769_s24  ;;  %s197_s30 = sshll.u32 %s189_s29, 4  ;;  %s198_s30 = int_to_ptr.vmem [resolvable:$true] %s197_s30 }
  0x1b   : > { %s195_s5 = sshll.u32 %s194_s28, 4  ;;  %p1153_p2 = pnand %p832_p5, %p37_p7  ;;  %s196_s5 = int_to_ptr.hbm [resolvable:$true] %s195_s5 }
  0x1c   : > { %s186_s9 = scalar_lea.sflag [#allocation3], %s185_s20  ;;  %s935_s11 = sshra.s32 %s196_s5, 4  ;;  %s936_s11 = int_to_ptr.hbm [resolvable:$true] %s935_s11 }
  0x1d   : > { %s937_s12 = scalar_lea.hbm %s936_s11, 256  ;;  %p939_p10 = pneg %p1153_p2 }
  0x1e   : > { %p938_p9 = scmp.ne.s32.totalorder %s936_s11, %s937_s12  ;;  %s942_s25 = scalar_lea.hbm %s1328_s0, 512 }
  0x1f   : > { %p943_p0 = scmp.lt.s32.totalorder %s936_s11, %s1328_s0  ;;  %p944_p5 = scmp.lt.s32.totalorder %s942_s25, %s937_s12 }
  0x20   : > { %p940_p12 = pnand %p939_p10, %p938_p9 }
  0x21   : > { %p945_p7 = por %p944_p5, %p943_p0 }
  0x22   : > { %p941_p13 = pneg %p940_p12 }
  0x24   : > { %p946_p11 = pnand %p945_p7, %p941_p13 }
  0x26   : > { %949 = shalt.err (!%p946_p11)
}
  0x27   : > { %825 = dma.hbm_to_vmem [thread:$0]  (!%p1153_p2), %s196_s5, 4096, %s198_s30, %s186_s9, %s1038_s6, %s1038_s6, %s1039_s7  }
  0x28   : > { %209 = sbr.rel (%p1111_p8) target bundleno = 341 (0x155), region = 36  ;;  %s1173_s20 = sand.u32 (!%p1111_p8), 1, %s1027_s16  }
  0x29   : > { %s760_s29 = sshll.u32 (!%p1111_p8), %s1173_s20, 8  ;;  %s212_s11 = scalar_lea.sflag (!%p1111_p8), [#allocation3], %s1173_s20 }
  0x2a   : > { %s1179_s12 = scalar_lea.vmem (!%p1111_p8), [#allocation2], %s760_s29 }
  0x2d   : > { %1010 = dma.done.wait (%p1098_p4), %s212_s11, 4096  }
  0x2e   : > { %1012 = vsyncadd (%p1098_p4), %s212_s11, 4294963200 }
  0x2f   : > { %1014 = dma.done.wait (%p42_p1), [#allocation6], 4096  }
  0x30   : > { %1016 = vsyncadd (%p42_p1), [#allocation6], 4294963200  ;;  %v348_v0 = vld [vmem:[#allocation7 + $0x78] sm:$0xff]  ;;  %v347_v2 = vld [vmem:[#allocation7 + $0x70] sm:$0xff]  ;;  %s1229_s6 = scalar_lea.vmem [#allocation8], %s760_s29  ;;  %s770_s7 = sshll.u32 %s1089_s19, 8 }
  0x31   : > { %v332_v1 = vld [vmem:[#allocation5 + $0x78] sm:$0xff]  ;;  %771 = vmatpush.msra.mxu2 %v348_v0  ;;  %v331_v3 = vld [vmem:[#allocation5 + $0x70] sm:$0xff]  ;;  %v346_v4 = vld [vmem:[#allocation7 + $0x68] sm:$0xff]  ;;  %349 = vmatpush.msra.mxu0 %v348_v0  ;;  %s655_s8 = scalar_lea.hbm %s1332_s4, %s770_s7  ;;  %s656_s9 = sshll.u32 %s1229_s6, 4  ;;  %s657_s9 = int_to_ptr.vmem [resolvable:$true] %s656_s9 }
  0x32   : > { %787 = vmatpush.msra.mxu3 %v332_v1  ;;  %v330_v5 = vld [vmem:[#allocation5 + $0x68] sm:$0xff]  ;;  %462 = vmatpush.msra.mxu1 %v332_v1  ;;  %v345_v6 = vld [vmem:[#allocation7 + $0x60] sm:$0xff]  ;;  %v344_v8 = vld [vmem:[#allocation7 + $0x58] sm:$0xff]  ;;  %s658_s24 = sshll.u32 %s655_s8, 4  ;;  %s644_s19 = scalar_lea.sflag [#allocation4], %s1173_s20  ;;  %s659_s24 = int_to_ptr.hbm [resolvable:$true] %s658_s24 }
  0x33   : > { %772 = vmatpush.msra.mxu2 %v347_v2  ;;  %v329_v7 = vld [vmem:[#allocation5 + $0x60] sm:$0xff]  ;;  %350 = vmatpush.msra.mxu0 %v347_v2  ;;  %v328_v9 = vld [vmem:[#allocation5 + $0x58] sm:$0xff]  ;;  %v343_v10 = vld [vmem:[#allocation7 + $0x50] sm:$0xff]  ;;  %s979_s23 = sshra.s32 %s659_s24, 4  ;;  %s985_s29 = scalar_lea.hbm %s1332_s4, 512  ;;  %s980_s23 = int_to_ptr.hbm [resolvable:$true] %s979_s23 }
  0x34   : > { %788 = vmatpush.msra.mxu3 %v331_v3  ;;  %463 = vmatpush.msra.mxu1 %v331_v3  ;;  %v327_v11 = vld [vmem:[#allocation5 + $0x50] sm:$0xff]  ;;  %v342_v12 = vld [vmem:[#allocation7 + $0x48] sm:$0xff]  ;;  %v341_v14 = vld [vmem:[#allocation7 + $0x40] sm:$0xff]  ;;  %s981_s25 = scalar_lea.hbm %s980_s23, 256  ;;  %p986_p11 = scmp.lt.s32.totalorder %s980_s23, %s1332_s4 }
  0x35   : > { %773 = vmatpush.msra.mxu2 %v346_v4  ;;  %351 = vmatpush.msra.mxu0 %v346_v4  ;;  %v326_v13 = vld [vmem:[#allocation5 + $0x48] sm:$0xff]  ;;  %v325_v15 = vld [vmem:[#allocation5 + $0x40] sm:$0xff]  ;;  %v340_v16 = vld [vmem:[#allocation7 + $0x38] sm:$0xff]  ;;  %p982_p1 = scmp.ne.s32.totalorder %s980_s23, %s981_s25  ;;  %p987_p2 = scmp.lt.s32.totalorder %s985_s29, %s981_s25 }
  0x36   : > { %789 = vmatpush.msra.mxu3 %v330_v5  ;;  %464 = vmatpush.msra.mxu1 %v330_v5  ;;  %v324_v17 = vld [vmem:[#allocation5 + $0x38] sm:$0xff]  ;;  %v339_v18 = vld [vmem:[#allocation7 + $0x30] sm:$0xff]  ;;  %v338_v20 = vld [vmem:[#allocation7 + $0x28] sm:$0xff] }
  0x37   : > { %774 = vmatpush.msra.mxu2 %v345_v6  ;;  %352 = vmatpush.msra.mxu0 %v345_v6  ;;  %v323_v19 = vld [vmem:[#allocation5 + $0x30] sm:$0xff]  ;;  %v322_v21 = vld [vmem:[#allocation5 + $0x28] sm:$0xff]  ;;  %v337_v22 = vld [vmem:[#allocation7 + $0x20] sm:$0xff]  ;;  %p983_p4 = pnand %p982_p1, %p1140_p3  ;;  %p988_p9 = por %p987_p2, %p986_p11 }
  0x38   : > { %790 = vmatpush.msra.mxu3 %v329_v7  ;;  %465 = vmatpush.msra.mxu1 %v329_v7  ;;  %v321_v23 = vld [vmem:[#allocation5 + $0x20] sm:$0xff]  ;;  %v336_v24 = vld [vmem:[#allocation7 + $0x18] sm:$0xff]  ;;  %v335_v26 = vld [vmem:[#allocation7 + $0x10] sm:$0xff] }
  0x39   : > { %775 = vmatpush.msra.mxu2 %v344_v8  ;;  %353 = vmatpush.msra.mxu0 %v344_v8  ;;  %v320_v25 = vld [vmem:[#allocation5 + $0x18] sm:$0xff]  ;;  %v319_v27 = vld [vmem:[#allocation5 + $0x10] sm:$0xff]  ;;  %v269_v28 = vld [vmem:[%s1179_s12 + $0x80] sm:$0xff]  ;;  %p984_p8 = pneg %p983_p4 }
  0x3a   : > { %791 = vmatpush.msra.mxu3 %v328_v9  ;;  %466 = vmatpush.msra.mxu1 %v328_v9  ;;  %v334_v29 = vld [vmem:[#allocation7 + $0x8] sm:$0xff]  ;;  %v253_v31 = vld [vmem:[%s1179_s12] sm:$0xff]  ;;  %v301_v34 = vmul.f32 %v269_v28, %v269_v28  ;;  %v271_v40 = vld [vmem:[%s1179_s12 + $0x90] sm:$0xff] }
  0x3b   : > { %776 = vmatpush.msra.mxu2 %v343_v10  ;;  %354 = vmatpush.msra.mxu0 %v343_v10  ;;  %v318_v30 = vld [vmem:[#allocation5 + $0x8] sm:$0xff]  ;;  %v333_v32 = vld [vmem:[#allocation7] sm:$0xff]  ;;  %v285_v35 = vmul.f32 %v253_v31, %v253_v31  ;;  %v255_v41 = vld [vmem:[%s1179_s12 + $0x10] sm:$0xff]  ;;  %v303_v42 = vmul.f32 %v271_v40, %v271_v40  ;;  %p989_p10 = pnand %p988_p9, %p984_p8 }
  0x3c   : > { %792 = vmatpush.msra.mxu3 %v327_v11  ;;  %467 = vmatpush.msra.mxu1 %v327_v11  ;;  %v317_v33 = vld [vmem:[#allocation5] sm:$0xff]  ;;  %v270_v36 = vld [vmem:[%s1179_s12 + $0x88] sm:$0xff]  ;;  %v287_v43 = vmul.f32 %v255_v41, %v255_v41  ;;  %v272_v44 = vld [vmem:[%s1179_s12 + $0x98] sm:$0xff] }
  0x3d   : > { %777 = vmatpush.msra.mxu2 %v342_v12  ;;  %355 = vmatpush.msra.mxu0 %v342_v12  ;;  %v254_v37 = vld [vmem:[%s1179_s12 + $0x8] sm:$0xff]  ;;  %v302_v38 = vmul.f32 %v270_v36, %v270_v36  ;;  %v256_v45 = vld [vmem:[%s1179_s12 + $0x18] sm:$0xff]  ;;  %v304_v46 = vmul.f32 %v272_v44, %v272_v44  ;;  %v273_v48 = vld [vmem:[%s1179_s12 + $0xa0] sm:$0xff] }
  0x3e   : > { %793 = vmatpush.msra.mxu3 %v326_v13  ;;  %468 = vmatpush.msra.mxu1 %v326_v13  ;;  %v286_v39 = vmul.f32 %v254_v37, %v254_v37  ;;  %v288_v47 = vmul.f32 %v256_v45, %v256_v45  ;;  %v257_v49 = vld [vmem:[%s1179_s12 + $0x20] sm:$0xff]  ;;  %v305_v50 = vmul.f32 %v273_v48, %v273_v48  ;;  %v274_v52 = vld [vmem:[%s1179_s12 + $0xa8] sm:$0xff]  ;;  %v275_v56 = vld [vmem:[%s1179_s12 + $0xb0] sm:$0xff] }
  0x3f   : > { %778 = vmatpush.msra.mxu2 %v341_v14  ;;  %356 = vmatpush.msra.mxu0 %v341_v14  ;;  %v289_v51 = vmul.f32 %v257_v49, %v257_v49  ;;  %v258_v53 = vld [vmem:[%s1179_s12 + $0x28] sm:$0xff]  ;;  %v306_v54 = vmul.f32 %v274_v52, %v274_v52  ;;  %v259_v57 = vld [vmem:[%s1179_s12 + $0x30] sm:$0xff]  ;;  %v307_v58 = vmul.f32 %v275_v56, %v275_v56  ;;  %v276_v60 = vld [vmem:[%s1179_s12 + $0xb8] sm:$0xff] }
  0x40   : > { %794 = vmatpush.msra.mxu3 %v325_v15  ;;  %469 = vmatpush.msra.mxu1 %v325_v15  ;;  %v290_v55 = vmul.f32 %v258_v53, %v258_v53  ;;  %v291_v59 = vmul.f32 %v259_v57, %v259_v57  ;;  %v260_v61 = vld [vmem:[%s1179_s12 + $0x38] sm:$0xff]  ;;  %v308_v62 = vmul.f32 %v276_v60, %v276_v60  ;;  %v277_v0 = vld [vmem:[%s1179_s12 + $0xc0] sm:$0xff]  ;;  %v278_v4 = vld [vmem:[%s1179_s12 + $0xc8] sm:$0xff] }
  0x41   : > { %779 = vmatpush.msra.mxu2 %v340_v16  ;;  %357 = vmatpush.msra.mxu0 %v340_v16  ;;  %v292_v63 = vmul.f32 %v260_v61, %v260_v61  ;;  %v261_v1 = vld [vmem:[%s1179_s12 + $0x40] sm:$0xff]  ;;  %v309_v2 = vmul.f32 %v277_v0, %v277_v0  ;;  %v262_v5 = vld [vmem:[%s1179_s12 + $0x48] sm:$0xff]  ;;  %v310_v6 = vmul.f32 %v278_v4, %v278_v4  ;;  %v279_v8 = vld [vmem:[%s1179_s12 + $0xd0] sm:$0xff] }
  0x42   : > { %795 = vmatpush.msra.mxu3 %v324_v17  ;;  %470 = vmatpush.msra.mxu1 %v324_v17  ;;  %v293_v3 = vmul.f32 %v261_v1, %v261_v1  ;;  %v294_v7 = vmul.f32 %v262_v5, %v262_v5  ;;  %v263_v9 = vld [vmem:[%s1179_s12 + $0x50] sm:$0xff]  ;;  %v311_v10 = vmul.f32 %v279_v8, %v279_v8  ;;  %v280_v12 = vld [vmem:[%s1179_s12 + $0xd8] sm:$0xff]  ;;  %v281_v16 = vld [vmem:[%s1179_s12 + $0xe0] sm:$0xff] }
  0x43   : > { %780 = vmatpush.msra.mxu2 %v339_v18  ;;  %358 = vmatpush.msra.mxu0 %v339_v18  ;;  %v295_v11 = vmul.f32 %v263_v9, %v263_v9  ;;  %v264_v13 = vld [vmem:[%s1179_s12 + $0x58] sm:$0xff]  ;;  %v312_v14 = vmul.f32 %v280_v12, %v280_v12  ;;  %v265_v17 = vld [vmem:[%s1179_s12 + $0x60] sm:$0xff]  ;;  %v313_v18 = vmul.f32 %v281_v16, %v281_v16 }
  0x44   : > { %796 = vmatpush.msra.mxu3 %v323_v19  ;;  %471 = vmatpush.msra.mxu1 %v323_v19  ;;  %v296_v15 = vmul.f32 %v264_v13, %v264_v13  ;;  %v297_v19 = vmul.f32 %v265_v17, %v265_v17 }
  0x45   : > { %781 = vmatpush.msra.mxu2 %v338_v20  ;;  %359 = vmatpush.msra.mxu0 %v338_v20  ;;  %v282_v20 = vld [vmem:[%s1179_s12 + $0xe8] sm:$0xff] }
  0x46   : > { %797 = vmatpush.msra.mxu3 %v322_v21  ;;  %472 = vmatpush.msra.mxu1 %v322_v21  ;;  %v266_v21 = vld [vmem:[%s1179_s12 + $0x68] sm:$0xff] }
  0x47   : > { %782 = vmatpush.msra.mxu2 %v337_v22  ;;  %360 = vmatpush.msra.mxu0 %v337_v22  ;;  %v314_v22 = vmul.f32 %v282_v20, %v282_v20 }
  0x48   : > { %798 = vmatpush.msra.mxu3 %v321_v23  ;;  %473 = vmatpush.msra.mxu1 %v321_v23  ;;  %v298_v23 = vmul.f32 %v266_v21, %v266_v21 }
  0x49   : > { %783 = vmatpush.msra.mxu2 %v336_v24  ;;  %361 = vmatpush.msra.mxu0 %v336_v24  ;;  %v283_v24 = vld [vmem:[%s1179_s12 + $0xf0] sm:$0xff] }
  0x4a   : > { %799 = vmatpush.msra.mxu3 %v320_v25  ;;  %474 = vmatpush.msra.mxu1 %v320_v25  ;;  %v267_v25 = vld [vmem:[%s1179_s12 + $0x70] sm:$0xff] }
  0x4b   : > { %784 = vmatpush.msra.mxu2 %v335_v26  ;;  %362 = vmatpush.msra.mxu0 %v335_v26  ;;  %v315_v26 = vmul.f32 %v283_v24, %v283_v24 }
  0x4c   : > { %800 = vmatpush.msra.mxu3 %v319_v27  ;;  %475 = vmatpush.msra.mxu1 %v319_v27  ;;  %v299_v27 = vmul.f32 %v267_v25, %v267_v25 }
  0x4d   : > { %785 = vmatpush.msra.mxu2 %v334_v29  ;;  %363 = vmatpush.msra.mxu0 %v334_v29  ;;  %v268_v29 = vld [vmem:[%s1179_s12 + $0x78] sm:$0xff] }
  0x4e   : > { %801 = vmatpush.msra.mxu3 %v318_v30  ;;  %476 = vmatpush.msra.mxu1 %v318_v30 }
  0x4f   : > { %786 = vmatpush.msra.mxu2 %v333_v32  ;;  %364 = vmatpush.msra.mxu0 %v333_v32  ;;  %v1224_v32 = vld [vmem:[%s1331_s3] ss:$0 sm:$0xff] }
  0x50   : > { %802 = vmatpush.msra.mxu3 %v317_v33  ;;  %413 = vmatmul.f32.vlgmr.msra.gmra.mxu2 %v301_v34 }
  0x51   : > { %526 = vmatmul.f32.vlgmr.msra.gmra.mxu3 %v269_v28  ;;  %477 = vmatpush.msra.mxu1 %v317_v33  ;;  %v284_v28 = vld [vmem:[%s1179_s12 + $0xf8] sm:$0xff] }
  0x52   : > { %365 = vmatmul.f32.vlgmr.msra.gmra.mxu0 %v285_v35  ;;  %478 = vmatmul.f32.vlgmr.msra.gmra.mxu1 %v253_v31  ;;  %v316_v30 = vmul.f32 %v284_v28, %v284_v28  ;;  %v300_v31 = vmul.f32 %v268_v29, %v268_v29 }
  0x58   : > { %416 = vmatmul.f32.gmra.mxu2 %v302_v38 }
  0x59   : > { %529 = vmatmul.f32.gmra.mxu3 %v270_v36 }
  0x5a   : > { %368 = vmatmul.f32.gmra.mxu0 %v286_v39  ;;  %481 = vmatmul.f32.gmra.mxu1 %v254_v37 }
  0x60   : > { %419 = vmatmul.f32.gmra.mxu2 %v303_v42 }
  0x61   : > { %532 = vmatmul.f32.gmra.mxu3 %v271_v40 }
  0x62   : > { %371 = vmatmul.f32.gmra.mxu0 %v287_v43  ;;  %484 = vmatmul.f32.gmra.mxu1 %v255_v41 }
  0x68   : > { %422 = vmatmul.f32.gmra.mxu2 %v304_v46 }
  0x69   : > { %535 = vmatmul.f32.gmra.mxu3 %v272_v44 }
  0x6a   : > { %374 = vmatmul.f32.gmra.mxu0 %v288_v47  ;;  %487 = vmatmul.f32.gmra.mxu1 %v256_v45 }
  0x70   : > { %425 = vmatmul.f32.gmra.mxu2 %v305_v50 }
  0x71   : > { %538 = vmatmul.f32.gmra.mxu3 %v273_v48 }
  0x72   : > { %377 = vmatmul.f32.gmra.mxu0 %v289_v51  ;;  %490 = vmatmul.f32.gmra.mxu1 %v257_v49 }
  0x78   : > { %428 = vmatmul.f32.gmra.mxu2 %v306_v54 }
  0x79   : > { %541 = vmatmul.f32.gmra.mxu3 %v274_v52 }
  0x7a   : > { %380 = vmatmul.f32.gmra.mxu0 %v290_v55  ;;  %493 = vmatmul.f32.gmra.mxu1 %v258_v53 }
  0x80   : > { %431 = vmatmul.f32.gmra.mxu2 %v307_v58 }
  0x81   : > { %544 = vmatmul.f32.gmra.mxu3 %v275_v56 }
  0x82   : > { %383 = vmatmul.f32.gmra.mxu0 %v291_v59  ;;  %496 = vmatmul.f32.gmra.mxu1 %v259_v57 }
  0x88   : > { %434 = vmatmul.f32.gmra.mxu2 %v308_v62 }
  0x89   : > { %547 = vmatmul.f32.gmra.mxu3 %v276_v60 }
  0x8a   : > { %386 = vmatmul.f32.gmra.mxu0 %v292_v63  ;;  %499 = vmatmul.f32.gmra.mxu1 %v260_v61 }
  0x90   : > { %437 = vmatmul.f32.gmra.mxu2 %v309_v2 }
  0x91   : > { %550 = vmatmul.f32.gmra.mxu3 %v277_v0 }
  0x92   : > { %389 = vmatmul.f32.gmra.mxu0 %v293_v3  ;;  %502 = vmatmul.f32.gmra.mxu1 %v261_v1 }
  0x98   : > { %440 = vmatmul.f32.gmra.mxu2 %v310_v6 }
  0x99   : > { %553 = vmatmul.f32.gmra.mxu3 %v278_v4 }
  0x9a   : > { %392 = vmatmul.f32.gmra.mxu0 %v294_v7  ;;  %505 = vmatmul.f32.gmra.mxu1 %v262_v5 }
  0xa0   : > { %443 = vmatmul.f32.gmra.mxu2 %v311_v10 }
  0xa1   : > { %556 = vmatmul.f32.gmra.mxu3 %v279_v8 }
  0xa2   : > { %395 = vmatmul.f32.gmra.mxu0 %v295_v11  ;;  %508 = vmatmul.f32.gmra.mxu1 %v263_v9 }
  0xa8   : > { %446 = vmatmul.f32.gmra.mxu2 %v312_v14 }
  0xa9   : > { %559 = vmatmul.f32.gmra.mxu3 %v280_v12 }
  0xaa   : > { %398 = vmatmul.f32.gmra.mxu0 %v296_v15  ;;  %511 = vmatmul.f32.gmra.mxu1 %v264_v13 }
  0xb0   : > { %449 = vmatmul.f32.gmra.mxu2 %v313_v18 }
  0xb1   : > { %562 = vmatmul.f32.gmra.mxu3 %v281_v16 }
  0xb2   : > { %401 = vmatmul.f32.gmra.mxu0 %v297_v19  ;;  %514 = vmatmul.f32.gmra.mxu1 %v265_v17 }
  0xb8   : > { %452 = vmatmul.f32.gmra.mxu2 %v314_v22 }
  0xb9   : > { %565 = vmatmul.f32.gmra.mxu3 %v282_v20 }
  0xba   : > { %404 = vmatmul.f32.gmra.mxu0 %v298_v23  ;;  %517 = vmatmul.f32.gmra.mxu1 %v266_v21 }
  0xc0   : > { %455 = vmatmul.f32.gmra.mxu2 %v315_v26 }
  0xc1   : > { %568 = vmatmul.f32.gmra.mxu3 %v283_v24 }
  0xc2   : > { %407 = vmatmul.f32.gmra.mxu0 %v299_v27  ;;  %520 = vmatmul.f32.gmra.mxu1 %v267_v25 }
  0xc8   : > { %458 = vmatmul.f32.gmra.mxu2 %v316_v30 }
  0xc9   : > { %571 = vmatmul.f32.gmra.mxu3 %v284_v28 }
  0xca   : > { %410 = vmatmul.f32.gmra.mxu0 %v300_v31  ;;  %523 = vmatmul.f32.gmra.mxu1 %v268_v29 }
  0xcf   : > { %v366_v33 = vpop.f32.mrf.mxu0  ;;  %v479_v34 = vpop.f32.mrf.mxu1 }
  0xd0   : > { %v480_v35 = vadd.f32 %v479_v34, %v366_v33 }
  0xd2   : > { %v579_v36 = vadd.f32 %v1224_v32, %v480_v35 }
  0xd3   : > { %v414_v37 = vpop.f32.mrf.mxu2 }
  0xd4   : > { %v527_v38 = vpop.f32.mrf.mxu3  ;;  %611 = vst [vmem:[%s1229_s6] sm:$0xff] %v579_v36 }
  0xd5   : > { %v528_v39 = vadd.f32 %v527_v38, %v414_v37 }
  0xd7   : > { %v595_v40 = vadd.f32 %v1224_v32, %v528_v39  ;;  %v369_v41 = vpop.f32.mrf.mxu0  ;;  %v482_v42 = vpop.f32.mrf.mxu1 }
  0xd8   : > { %v483_v43 = vadd.f32 %v482_v42, %v369_v41 }
  0xd9   : > { %627 = vst [vmem:[%s1229_s6 + $0x80] sm:$0xff] %v595_v40 }
  0xda   : > { %v580_v44 = vadd.f32 %v1224_v32, %v483_v43 }
  0xdb   : > { %v417_v45 = vpop.f32.mrf.mxu2 }
  0xdc   : > { %v530_v46 = vpop.f32.mrf.mxu3  ;;  %612 = vst [vmem:[%s1229_s6 + $0x8] sm:$0xff] %v580_v44 }
  0xdd   : > { %v531_v47 = vadd.f32 %v530_v46, %v417_v45 }
  0xdf   : > { %v596_v48 = vadd.f32 %v1224_v32, %v531_v47  ;;  %v372_v49 = vpop.f32.mrf.mxu0  ;;  %v485_v50 = vpop.f32.mrf.mxu1 }
  0xe0   : > { %v486_v51 = vadd.f32 %v485_v50, %v372_v49 }
  0xe1   : > { %628 = vst [vmem:[%s1229_s6 + $0x88] sm:$0xff] %v596_v48 }
  0xe2   : > { %v581_v52 = vadd.f32 %v1224_v32, %v486_v51 }
  0xe3   : > { %v420_v53 = vpop.f32.mrf.mxu2 }
  0xe4   : > { %v533_v54 = vpop.f32.mrf.mxu3  ;;  %613 = vst [vmem:[%s1229_s6 + $0x10] sm:$0xff] %v581_v52 }
  0xe5   : > { %v534_v55 = vadd.f32 %v533_v54, %v420_v53 }
  0xe7   : > { %v597_v56 = vadd.f32 %v1224_v32, %v534_v55  ;;  %v375_v57 = vpop.f32.mrf.mxu0  ;;  %v488_v58 = vpop.f32.mrf.mxu1 }
  0xe8   : > { %v489_v59 = vadd.f32 %v488_v58, %v375_v57 }
  0xe9   : > { %629 = vst [vmem:[%s1229_s6 + $0x90] sm:$0xff] %v597_v56 }
  0xea   : > { %v582_v60 = vadd.f32 %v1224_v32, %v489_v59 }
  0xeb   : > { %v423_v61 = vpop.f32.mrf.mxu2 }
  0xec   : > { %v536_v62 = vpop.f32.mrf.mxu3  ;;  %614 = vst [vmem:[%s1229_s6 + $0x18] sm:$0xff] %v582_v60 }
  0xed   : > { %v537_v63 = vadd.f32 %v536_v62, %v423_v61 }
  0xef   : > { %v598_v0 = vadd.f32 %v1224_v32, %v537_v63  ;;  %v378_v1 = vpop.f32.mrf.mxu0  ;;  %v491_v2 = vpop.f32.mrf.mxu1 }
  0xf0   : > { %v492_v3 = vadd.f32 %v491_v2, %v378_v1 }
  0xf1   : > { %630 = vst [vmem:[%s1229_s6 + $0x98] sm:$0xff] %v598_v0 }
  0xf2   : > { %v583_v4 = vadd.f32 %v1224_v32, %v492_v3 }
  0xf3   : > { %v426_v5 = vpop.f32.mrf.mxu2 }
  0xf4   : > { %v539_v6 = vpop.f32.mrf.mxu3  ;;  %615 = vst [vmem:[%s1229_s6 + $0x20] sm:$0xff] %v583_v4 }
  0xf5   : > { %v540_v7 = vadd.f32 %v539_v6, %v426_v5 }
  0xf7   : > { %v599_v8 = vadd.f32 %v1224_v32, %v540_v7  ;;  %v381_v9 = vpop.f32.mrf.mxu0  ;;  %v494_v10 = vpop.f32.mrf.mxu1 }
  0xf8   : > { %v495_v11 = vadd.f32 %v494_v10, %v381_v9 }
  0xf9   : > { %631 = vst [vmem:[%s1229_s6 + $0xa0] sm:$0xff] %v599_v8 }
  0xfa   : > { %v584_v12 = vadd.f32 %v1224_v32, %v495_v11 }
  0xfb   : > { %v429_v13 = vpop.f32.mrf.mxu2 }
  0xfc   : > { %v542_v14 = vpop.f32.mrf.mxu3  ;;  %616 = vst [vmem:[%s1229_s6 + $0x28] sm:$0xff] %v584_v12 }
  0xfd   : > { %v543_v15 = vadd.f32 %v542_v14, %v429_v13 }
  0xff   : > { %v600_v16 = vadd.f32 %v1224_v32, %v543_v15  ;;  %v384_v17 = vpop.f32.mrf.mxu0  ;;  %v497_v18 = vpop.f32.mrf.mxu1 }
 0x100   : > { %v498_v19 = vadd.f32 %v497_v18, %v384_v17 }
 0x101   : > { %632 = vst [vmem:[%s1229_s6 + $0xa8] sm:$0xff] %v600_v16 }
 0x102   : > { %v585_v20 = vadd.f32 %v1224_v32, %v498_v19 }
 0x103   : > { %v432_v21 = vpop.f32.mrf.mxu2 }
 0x104   : > { %v545_v22 = vpop.f32.mrf.mxu3  ;;  %617 = vst [vmem:[%s1229_s6 + $0x30] sm:$0xff] %v585_v20 }
 0x105   : > { %v546_v23 = vadd.f32 %v545_v22, %v432_v21 }
 0x107   : > { %v601_v24 = vadd.f32 %v1224_v32, %v546_v23  ;;  %v387_v25 = vpop.f32.mrf.mxu0  ;;  %v500_v26 = vpop.f32.mrf.mxu1 }
 0x108   : > { %v501_v27 = vadd.f32 %v500_v26, %v387_v25 }
 0x109   : > { %633 = vst [vmem:[%s1229_s6 + $0xb0] sm:$0xff] %v601_v24 }
 0x10a   : > { %v586_v28 = vadd.f32 %v1224_v32, %v501_v27 }
 0x10b   : > { %v435_v29 = vpop.f32.mrf.mxu2 }
 0x10c   : > { %v548_v30 = vpop.f32.mrf.mxu3  ;;  %618 = vst [vmem:[%s1229_s6 + $0x38] sm:$0xff] %v586_v28 }
 0x10d   : > { %v549_v31 = vadd.f32 %v548_v30, %v435_v29 }
 0x10f   : > { %v602_v33 = vadd.f32 %v1224_v32, %v549_v31  ;;  %v390_v34 = vpop.f32.mrf.mxu0  ;;  %v503_v35 = vpop.f32.mrf.mxu1 }
 0x110   : > { %v504_v36 = vadd.f32 %v503_v35, %v390_v34 }
 0x111   : > { %634 = vst [vmem:[%s1229_s6 + $0xb8] sm:$0xff] %v602_v33 }
 0x112   : > { %v587_v37 = vadd.f32 %v1224_v32, %v504_v36 }
 0x113   : > { %v438_v38 = vpop.f32.mrf.mxu2 }
 0x114   : > { %v551_v39 = vpop.f32.mrf.mxu3  ;;  %619 = vst [vmem:[%s1229_s6 + $0x40] sm:$0xff] %v587_v37 }
 0x115   : > { %v552_v40 = vadd.f32 %v551_v39, %v438_v38 }
 0x117   : > { %v603_v41 = vadd.f32 %v1224_v32, %v552_v40  ;;  %v393_v42 = vpop.f32.mrf.mxu0  ;;  %v506_v43 = vpop.f32.mrf.mxu1 }
 0x118   : > { %v507_v44 = vadd.f32 %v506_v43, %v393_v42 }
 0x119   : > { %635 = vst [vmem:[%s1229_s6 + $0xc0] sm:$0xff] %v603_v41 }
 0x11a   : > { %v588_v45 = vadd.f32 %v1224_v32, %v507_v44 }
 0x11b   : > { %v441_v46 = vpop.f32.mrf.mxu2 }
 0x11c   : > { %v554_v47 = vpop.f32.mrf.mxu3  ;;  %620 = vst [vmem:[%s1229_s6 + $0x48] sm:$0xff] %v588_v45 }
 0x11d   : > { %v555_v48 = vadd.f32 %v554_v47, %v441_v46 }
 0x11f   : > { %v604_v49 = vadd.f32 %v1224_v32, %v555_v48  ;;  %v396_v50 = vpop.f32.mrf.mxu0  ;;  %v509_v51 = vpop.f32.mrf.mxu1 }
 0x120   : > { %v510_v52 = vadd.f32 %v509_v51, %v396_v50 }
 0x121   : > { %636 = vst [vmem:[%s1229_s6 + $0xc8] sm:$0xff] %v604_v49 }
 0x122   : > { %v589_v53 = vadd.f32 %v1224_v32, %v510_v52 }
 0x123   : > { %v444_v54 = vpop.f32.mrf.mxu2 }
 0x124   : > { %v557_v55 = vpop.f32.mrf.mxu3  ;;  %621 = vst [vmem:[%s1229_s6 + $0x50] sm:$0xff] %v589_v53 }
 0x125   : > { %v558_v56 = vadd.f32 %v557_v55, %v444_v54 }
 0x127   : > { %v605_v57 = vadd.f32 %v1224_v32, %v558_v56  ;;  %v399_v58 = vpop.f32.mrf.mxu0  ;;  %v512_v59 = vpop.f32.mrf.mxu1 }
 0x128   : > { %v513_v60 = vadd.f32 %v512_v59, %v399_v58 }
 0x129   : > { %637 = vst [vmem:[%s1229_s6 + $0xd0] sm:$0xff] %v605_v57 }
 0x12a   : > { %v590_v61 = vadd.f32 %v1224_v32, %v513_v60 }
 0x12b   : > { %v447_v62 = vpop.f32.mrf.mxu2 }
 0x12c   : > { %v560_v63 = vpop.f32.mrf.mxu3  ;;  %622 = vst [vmem:[%s1229_s6 + $0x58] sm:$0xff] %v590_v61 }
 0x12d   : > { %v561_v0 = vadd.f32 %v560_v63, %v447_v62 }
 0x12f   : > { %v606_v1 = vadd.f32 %v1224_v32, %v561_v0  ;;  %v402_v2 = vpop.f32.mrf.mxu0  ;;  %v515_v3 = vpop.f32.mrf.mxu1 }
 0x130   : > { %v516_v4 = vadd.f32 %v515_v3, %v402_v2 }
 0x131   : > { %638 = vst [vmem:[%s1229_s6 + $0xd8] sm:$0xff] %v606_v1 }
 0x132   : > { %v591_v5 = vadd.f32 %v1224_v32, %v516_v4 }
 0x133   : > { %v450_v6 = vpop.f32.mrf.mxu2 }
 0x134   : > { %v563_v7 = vpop.f32.mrf.mxu3  ;;  %623 = vst [vmem:[%s1229_s6 + $0x60] sm:$0xff] %v591_v5 }
 0x135   : > { %v564_v8 = vadd.f32 %v563_v7, %v450_v6 }
 0x137   : > { %v607_v9 = vadd.f32 %v1224_v32, %v564_v8  ;;  %v405_v10 = vpop.f32.mrf.mxu0  ;;  %v518_v11 = vpop.f32.mrf.mxu1 }
 0x138   : > { %v519_v12 = vadd.f32 %v518_v11, %v405_v10 }
 0x139   : > { %639 = vst [vmem:[%s1229_s6 + $0xe0] sm:$0xff] %v607_v9 }
 0x13a   : > { %v592_v13 = vadd.f32 %v1224_v32, %v519_v12 }
 0x13b   : > { %v453_v14 = vpop.f32.mrf.mxu2 }
 0x13c   : > { %v566_v15 = vpop.f32.mrf.mxu3  ;;  %624 = vst [vmem:[%s1229_s6 + $0x68] sm:$0xff] %v592_v13 }
 0x13d   : > { %v567_v16 = vadd.f32 %v566_v15, %v453_v14 }
 0x13f   : > { %v608_v17 = vadd.f32 %v1224_v32, %v567_v16  ;;  %v408_v18 = vpop.f32.mrf.mxu0  ;;  %v521_v19 = vpop.f32.mrf.mxu1 }
 0x140   : > { %v522_v20 = vadd.f32 %v521_v19, %v408_v18 }
 0x141   : > { %640 = vst [vmem:[%s1229_s6 + $0xe8] sm:$0xff] %v608_v17 }
 0x142   : > { %v593_v21 = vadd.f32 %v1224_v32, %v522_v20 }
 0x143   : > { %v456_v22 = vpop.f32.mrf.mxu2 }
 0x144   : > { %v569_v23 = vpop.f32.mrf.mxu3  ;;  %625 = vst [vmem:[%s1229_s6 + $0x70] sm:$0xff] %v593_v21 }
 0x145   : > { %v570_v24 = vadd.f32 %v569_v23, %v456_v22 }
 0x147   : > { %v609_v25 = vadd.f32 %v1224_v32, %v570_v24  ;;  %v411_v26 = vpop.f32.mrf.mxu0  ;;  %v524_v27 = vpop.f32.mrf.mxu1 }
 0x148   : > { %v525_v28 = vadd.f32 %v524_v27, %v411_v26 }
 0x149   : > { %641 = vst [vmem:[%s1229_s6 + $0xf0] sm:$0xff] %v609_v25 }
 0x14a   : > { %v594_v29 = vadd.f32 %v1224_v32, %v525_v28 }
 0x14b   : > { %v459_v30 = vpop.f32.mrf.mxu2 }
 0x14c   : > { %v572_v31 = vpop.f32.mrf.mxu3  ;;  %626 = vst [vmem:[%s1229_s6 + $0x78] sm:$0xff] %v594_v29 }
 0x14d   : > { %v573_v33 = vadd.f32 %v572_v31, %v459_v30 }
 0x14f   : > { %v610_v34 = vadd.f32 %v1224_v32, %v573_v33 }
 0x151   : > { %642 = vst [vmem:[%s1229_s6 + $0xf8] sm:$0xff] %v610_v34 }
 0x152   : > { %992 = shalt.err (!%p989_p10)
}
 0x153   : > { %s1041_s20 = smov 128   ;;  %s1042_s21 = smov 8  }
 0x154   : > { %813 = dma.vmem_to_hbm [thread:$0]  (%p1140_p3), %s657_s9, 4096, %s659_s24, %s644_s19, %s1041_s20, %s1041_s20, %s1042_s21  }
 0x155 PF: > { %s673_s26 = sand.u32 1, %s1023_s15   ;;  %p1338_p12 = scmp.ge.s32.totalorder %s1035_s18, 2 }
 0x156   : > { %s674_s6 = scalar_lea.sflag [#allocation4], %s673_s26 }
 0x157   : > { %p827_p13 = pnand %p1338_p12, %p1103_p6 }
 0x159   : > { %p828_p0 = pneg %p827_p13 }
 0x15b   : > { %1018 = dma.done.wait (%p828_p0), %s674_s6, 4096  }
 0x15c   : > { %1020 = vsyncadd (%p828_p0), %s674_s6, 4294963200  ;;  %p18_p5 = scmp.ge.s32.totalorder %s1130_s10, 4   ;;  %s1339_s15 = smov %s1027_s16 }
 0x15d   : > { %s1340_s16 = smov %s1031_s17  ;;  %s1341_s17 = smov %s1146_s14 }
 0x15e   : > { %s1342_s18 = smov %s1130_s10  ;;  %20 = sbr.rel (!%p18_p5) target bundleno = 6 (0x6), region = 89 }
 0x163   :  { %680 = vsyncpa [#allocation3], 1 }
 0x164   :  { %682 = vsyncpa [#allocation3 + $0x1], 1 }
 0x165   :  { %683 = vsyncpa [#allocation6], 1 }
 0x166   :  { %684 = vsyncpa [#allocation4], 1 }
 0x167   :  { %686 = vsyncpa [#allocation4 + $0x1], 1 }

</bundles_post_ra>
